<compile_context>
chip_gen: v5e
topology: v5e:2x2
jax: 0.10.0
libtpu: 0.0.40
codegen_flags: <defaults>
</compile_context>

<pallas_src>
import functools

import numpy as np
import jax
import jax.numpy as jnp
from jax import lax
from jax.experimental import pallas as pl
from jax.experimental.pallas import tpu as pltpu


# ----------------------------------------------------------------------------
# Host-side (trace-time) mel filterbank construction — identical math to the
# numpy code inside Fbank.forward.  It is a compile-time constant.
# ----------------------------------------------------------------------------
def _mel_filterbank(sample_rate, nfft, nfilt):
    low_freq_mel = 0.0
    high_freq_mel = 2595.0 * np.log10(1.0 + sample_rate / 2.0 / 700.0)
    mel_points = np.linspace(low_freq_mel, high_freq_mel, nfilt + 2)
    hz_points = 700.0 * (10.0 ** (mel_points / 2595.0) - 1.0)
    bins = np.floor((nfft + 1) * hz_points / sample_rate)
    n_freq = int(np.floor(nfft / 2 + 1))
    fbank = np.zeros((nfilt, n_freq), dtype=np.float64)
    for m in range(1, nfilt + 1):
        f_m_minus = int(bins[m - 1])
        f_m = int(bins[m])
        f_m_plus = int(bins[m + 1])
        for k in range(f_m_minus, f_m):
            fbank[m - 1, k] = (k - bins[m - 1]) / (bins[m] - bins[m - 1])
        for k in range(f_m, f_m_plus):
            fbank[m - 1, k] = (bins[m + 1] - k) / (bins[m + 1] - bins[m])
    return fbank.astype(np.float32)


# ----------------------------------------------------------------------------
# Kernel bodies
# ----------------------------------------------------------------------------
def _project(w_ref, x_ref):
    # (Fp, K) @ (TN, K)^T -> (Fp, TN) channel-major tile, f32 MXU accumulation.
    # rhs contraction on its last dim (A @ B^T) is MXU-native: no transpose op.
    return lax.dot_general(
        w_ref[...], x_ref[...],
        dimension_numbers=(((1,), (1,)), ((), ())),
        preferred_element_type=jnp.float32)


def _stats_kernel(w_ref, x_ref, sum_ref, ssq_ref, *, n_rows, row_tile):
    """Pass 1: accumulate per-channel sum and sum-of-squares across row tiles."""
    i = pl.program_id(0)

    @pl.when(i == 0)
    def _init():
        sum_ref[...] = jnp.zeros_like(sum_ref)
        ssq_ref[...] = jnp.zeros_like(ssq_ref)

    y = _project(w_ref, x_ref)                                   # (Fp, TN) f32
    # Mask rows beyond N: padding of a partial last tile holds undefined data
    # and must not enter the statistics.
    col = lax.broadcasted_iota(jnp.int32, y.shape, 1) + i * row_tile
    y = jnp.where(col < n_rows, y, 0.0)
    # Single-traversal fused sum / sumsq (XLU lane reductions); accumulators
    # are VMEM-resident outputs revisited across the whole ("arbitrary") grid.
    sum_ref[...] += jnp.sum(y, axis=1, keepdims=True)
    ssq_ref[...] += jnp.sum(y * y, axis=1, keepdims=True)


def _normalize_kernel(w_ref, sum_ref, ssq_ref, x_ref, o_ref, *, n_rows, eps):
    """Pass 2: recompute projection for this tile, normalize, store."""
    y = _project(w_ref, x_ref)                                   # (Fp, TN) f32
    inv_n = jnp.float32(1.0 / n_rows)
    mean = sum_ref[...] * inv_n                                  # (Fp, 1)
    # Biased variance (matches nn.LayerNorm).  E[y^2]-mean^2 in f32 is well
    # within tolerance at these magnitudes; use Welford if scales grow.
    var = jnp.maximum(ssq_ref[...] * inv_n - mean * mean, 0.0)
    inv_std = lax.rsqrt(var + jnp.float32(eps))                  # EUP rsqrt
    o_ref[...] = ((y - mean) * inv_std).astype(o_ref.dtype)


# ----------------------------------------------------------------------------
# Wrapper
# ----------------------------------------------------------------------------
def fbank_forward(pow_frames, sample_rate=16000, nfft=400, nfilt=26,
                  eps=1e-5, row_tile=2048):
    """Pallas equivalent of Fbank.forward.  pow_frames: (B, T, NFFT//2+1).

    Pass bf16 pow_frames to halve the dominant HBM read; accumulation and all
    statistics stay in f32.  Output is (B, T, nfilt) in f32.
    """
    B, T, K = pow_frames.shape
    fbank = _mel_filterbank(sample_rate, nfft, nfilt)            # (nfilt, K)
    assert fbank.shape[1] == K, "pow_frames last dim must be NFFT//2 + 1"

    f_pad = ((nfilt + 7) // 8) * 8                               # 26 -> 32 sublanes
    w_np = np.zeros((f_pad, K), dtype=np.float32)
    w_np[:nfilt] = fbank

    n = B * T
    x2d = pow_frames.reshape(n, K)                  # keep caller's dtype
    w = jnp.asarray(w_np).astype(x2d.dtype)

    # Row tile: whole problem if it already fits one tile, else a 128-aligned
    # tile (lane-dense output stores, sublane-aligned x blocks).
    if n <= row_tile:
        tn = n
    else:
        tn = max(128, (row_tile // 128) * 128)
    nt = pl.cdiv(n, tn)

    itemsize = jnp.dtype(x2d.dtype).itemsize
    x_bytes = n * K * itemsize
    w_bytes = f_pad * K * itemsize
    vmem_limit = 32 * 1024 * 1024                   # fits v5e/v6e/v7x budgets

    # ---- pass 1: per-channel sum / sum-of-squares ---------------------------
    stat_sum, stat_ssq = pl.pallas_call(
        functools.partial(_stats_kernel, n_rows=n, row_tile=tn),
        out_shape=(jax.ShapeDtypeStruct((f_pad, 1), jnp.float32),
                   jax.ShapeDtypeStruct((f_pad, 1), jnp.float32)),
        grid_spec=pltpu.PrefetchScalarGridSpec(
            num_scalar_prefetch=0,
            grid=(nt,),
            in_specs=[
                pl.BlockSpec((f_pad, K), lambda i: (0, 0)),      # weights (resident)
                pl.BlockSpec((tn, K), lambda i: (i, 0)),         # x row tile (pipelined)
            ],
            out_specs=(
                pl.BlockSpec((f_pad, 1), lambda i: (0, 0)),      # sum accumulator
                pl.BlockSpec((f_pad, 1), lambda i: (0, 0)),      # sumsq accumulator
            )),
        compiler_params=pltpu.CompilerParams(
            dimension_semantics=("arbitrary",),                  # reduction axis
            vmem_limit_bytes=vmem_limit),
        cost_estimate=pl.CostEstimate(
            flops=2 * n * K * f_pad, transcendentals=0,
            bytes_accessed=x_bytes + w_bytes + 2 * f_pad * 4),
    )(w, x2d)

    # ---- pass 2: recompute projection, normalize, store channel-major -------
    out_cm = pl.pallas_call(
        functools.partial(_normalize_kernel, n_rows=n, eps=float(eps)),
        out_shape=jax.ShapeDtypeStruct((f_pad, n), jnp.float32),
        grid_spec=pltpu.PrefetchScalarGridSpec(
            num_scalar_prefetch=0,
            grid=(nt,),
            in_specs=[
                pl.BlockSpec((f_pad, K), lambda i: (0, 0)),      # weights
                pl.BlockSpec((f_pad, 1), lambda i: (0, 0)),      # per-channel sum
                pl.BlockSpec((f_pad, 1), lambda i: (0, 0)),      # per-channel sumsq
                pl.BlockSpec((tn, K), lambda i: (i, 0)),         # x row tile
            ],
            out_specs=pl.BlockSpec((f_pad, tn), lambda i: (0, i))),
        compiler_params=pltpu.CompilerParams(
            dimension_semantics=("parallel",),                   # megacore on v7x
            vmem_limit_bytes=vmem_limit),
        cost_estimate=pl.CostEstimate(
            flops=2 * n * K * f_pad + 4 * n * f_pad,
            transcendentals=f_pad * nt,
            bytes_accessed=x_bytes + w_bytes + f_pad * n * 4),
    )(w, stat_sum, stat_ssq, x2d)                                # (f_pad, n)

    # Drop padded channels and restore (B, T, nfilt).  Channel-major consumers
    # can use out_cm[:nfilt] directly and skip this small XLA transpose.
    return out_cm[:nfilt].T.reshape(B, T, nfilt)


# ----------------------------------------------------------------------------
# Pure-JAX reference (mirrors the PyTorch module exactly) for validation.
# ----------------------------------------------------------------------------
def fbank_reference(pow_frames, sample_rate=16000, nfft=400, nfilt=26, eps=1e-5):
    fbank = jnp.asarray(_mel_filterbank(sample_rate, nfft, nfilt))  # (F, K)
    y = jnp.einsum("btk,fk->btf", pow_frames.astype(jnp.float32), fbank)
    mean = jnp.mean(y, axis=(0, 1), keepdims=True)                  # per channel
    var = jnp.mean((y - mean) ** 2, axis=(0, 1), keepdims=True)
    return (y - mean) / jnp.sqrt(var + eps)


if __name__ == "__main__":
    SAMPLE_RATE, NFFT, NFILT = 16000, 400, 26
    K = NFFT // 2 + 1                                   # 201 frequency bins

    # Small shapes consistent with the module defaults: batch=2, 8 time frames.
    B, T = 2, 8
    key = jax.random.PRNGKey(0)
    pow_frames = jax.random.uniform(key, (B, T, K), dtype=jnp.float32) * 4.0

    out = jax.block_until_ready(fbank_forward(pow_frames, SAMPLE_RATE, NFFT, NFILT))
    ref = fbank_reference(pow_frames, SAMPLE_RATE, NFFT, NFILT)
    assert out.shape == (B, T, NFILT)
    assert bool(jnp.all(jnp.isfinite(out)))
    assert bool(jnp.allclose(out, ref, rtol=1e-2, atol=1e-2))

    # Multi-tile / pipelined path with a partial last row tile (exercises the
    # stats masking, cross-tile accumulation, and the parallel normalize pass).
    B2, T2 = 4, 300                                     # N=1200, row_tile=512 -> 3 tiles
    pow2 = jax.random.uniform(jax.random.PRNGKey(1), (B2, T2, K),
                              dtype=jnp.float32) * 4.0
    out2 = jax.block_until_ready(
        fbank_forward(pow2, SAMPLE_RATE, NFFT, NFILT, row_tile=512))
    ref2 = fbank_reference(pow2, SAMPLE_RATE, NFFT, NFILT)
    assert out2.shape == (B2, T2, NFILT)
    assert bool(jnp.all(jnp.isfinite(out2)))
    assert bool(jnp.allclose(out2, ref2, rtol=1e-2, atol=1e-2))

    # bf16 input path (production: halves the dominant HBM read); f32 MXU
    # accumulation + f32 stats keep it close to the f32 reference.
    out_bf16 = jax.block_until_ready(
        fbank_forward(pow_frames.astype(jnp.bfloat16), SAMPLE_RATE, NFFT, NFILT))
    assert bool(jnp.all(jnp.isfinite(out_bf16)))
    assert bool(jnp.allclose(out_bf16, ref, rtol=5e-2, atol=5e-2))

    print("KERNEL_OK")
</pallas_src>

<mosaic_0001>
module attributes {stable_mosaic.version = 11 : i64} {
  func.func @_stats_kernel(%arg0: i32, %arg1: memref<32x201xf32, #tpu.memory_space<vmem>>, %arg2: memref<16x201xf32, #tpu.memory_space<vmem>>, %arg3: memref<32x1xf32, #tpu.memory_space<vmem>>, %arg4: memref<32x1xf32, #tpu.memory_space<vmem>>) attributes {dimension_semantics = [#tpu.dimension_semantics<arbitrary>], iteration_bounds = array<i64: 1>, scalar_prefetch = 0 : i64, scratch_operands = 0 : i64, tpu.core_type = #tpu.core_type<tc>, window_params = [{pipeline_mode = #tpu.pipeline_mode<synchronous>, transform_indices = @transform_0, window_bounds = array<i64: 32, 201>}, {transform_indices = @transform_1, window_bounds = array<i64: 16, 201>}, {pipeline_mode = #tpu.pipeline_mode<synchronous>, transform_indices = @transform_2, window_bounds = array<i64: 32, 1>}, {pipeline_mode = #tpu.pipeline_mode<synchronous>, transform_indices = @transform_3, window_bounds = array<i64: 32, 1>}]} {
    %c0_i32 = arith.constant 0 : i32
    %0 = arith.cmpi eq, %arg0, %c0_i32 : i32
    %1 = arith.extui %0 : i1 to i32
    %c0_i32_0 = arith.constant 0 : i32
    %2 = arith.cmpi ne, %1, %c0_i32_0 : i32
    scf.if %2 {
      %cst_16 = arith.constant 0.000000e+00 : f32
      %25 = vector.broadcast %cst_16 : f32 to vector<32x1xf32>
      %c0_17 = arith.constant 0 : index
      %c0_18 = arith.constant 0 : index
      %26 = vector.load %arg3[%c0_17, %c0_18] : memref<32x1xf32, #tpu.memory_space<vmem>>, vector<32x1xf32>
      tpu.vector_store %arg3[%c0_17, %c0_18], %25 {strides = array<i32>} : memref<32x1xf32, #tpu.memory_space<vmem>>, vector<32x1xf32>,
      %cst_19 = arith.constant 0.000000e+00 : f32
      %27 = vector.broadcast %cst_19 : f32 to vector<32x1xf32>
      %c0_20 = arith.constant 0 : index
      %c0_21 = arith.constant 0 : index
      %28 = vector.load %arg4[%c0_20, %c0_21] : memref<32x1xf32, #tpu.memory_space<vmem>>, vector<32x1xf32>
      tpu.vector_store %arg4[%c0_20, %c0_21], %27 {strides = array<i32>} : memref<32x1xf32, #tpu.memory_space<vmem>>, vector<32x1xf32>,
    } else {
    }
    %c0 = arith.constant 0 : index
    %c0_1 = arith.constant 0 : index
    %3 = vector.load %arg1[%c0, %c0_1] : memref<32x201xf32, #tpu.memory_space<vmem>>, vector<32x201xf32>
    %c0_2 = arith.constant 0 : index
    %c0_3 = arith.constant 0 : index
    %4 = vector.load %arg2[%c0_2, %c0_3] : memref<16x201xf32, #tpu.memory_space<vmem>>, vector<16x201xf32>
    %cst = arith.constant dense<0.000000e+00> : vector<32x16xf32>
    %5 = tpu.matmul %3, %4, %cst {dimension_numbers = #tpu.dot_dimension_numbers<[1], [1], [0], [0], [0, 0, 1, 0], [], []>} : vector<32x201xf32>, vector<16x201xf32>, vector<32x16xf32> -> vector<32x16xf32>
    %6 = tpu.iota {dimensions = array<i32: 1>} : vector<32x16xi32>
    %c16_i32 = arith.constant 16 : i32
    %7 = arith.muli %arg0, %c16_i32 : i32
    %8 = vector.broadcast %7 : i32 to vector<32x16xi32>
    %9 = arith.addi %6, %8 : vector<32x16xi32>
    %c16_i32_4 = arith.constant 16 : i32
    %10 = vector.broadcast %c16_i32_4 : i32 to vector<32x16xi32>
    %11 = arith.cmpi slt, %9, %10 : vector<32x16xi32>
    %cst_5 = arith.constant 0.000000e+00 : f32
    %12 = vector.broadcast %cst_5 : f32 to vector<32x16xf32>
    %13 = arith.select %11, %5, %12 : vector<32x16xi1>, vector<32x16xf32>
    %c0_6 = arith.constant 0 : index
    %c0_7 = arith.constant 0 : index
    %14 = vector.load %arg3[%c0_6, %c0_7] : memref<32x1xf32, #tpu.memory_space<vmem>>, vector<32x1xf32>
    %cst_8 = arith.constant dense<0.000000e+00> : vector<32xf32>
    %15 = vector.multi_reduction <add>, %13, %cst_8 [1] : vector<32x16xf32> to vector<32xf32>
    %16 = vector.shape_cast %15 : vector<32xf32> to vector<32x1xf32>
    %17 = arith.addf %14, %16 : vector<32x1xf32>
    %c0_9 = arith.constant 0 : index
    %c0_10 = arith.constant 0 : index
    %18 = vector.load %arg3[%c0_9, %c0_10] : memref<32x1xf32, #tpu.memory_space<vmem>>, vector<32x1xf32>
    tpu.vector_store %arg3[%c0_9, %c0_10], %17 {strides = array<i32>} : memref<32x1xf32, #tpu.memory_space<vmem>>, vector<32x1xf32>,
    %c0_11 = arith.constant 0 : index
    %c0_12 = arith.constant 0 : index
    %19 = vector.load %arg4[%c0_11, %c0_12] : memref<32x1xf32, #tpu.memory_space<vmem>>, vector<32x1xf32>
    %20 = arith.mulf %13, %13 : vector<32x16xf32>
    %cst_13 = arith.constant dense<0.000000e+00> : vector<32xf32>
    %21 = vector.multi_reduction <add>, %20, %cst_13 [1] : vector<32x16xf32> to vector<32xf32>
    %22 = vector.shape_cast %21 : vector<32xf32> to vector<32x1xf32>
    %23 = arith.addf %19, %22 : vector<32x1xf32>
    %c0_14 = arith.constant 0 : index
    %c0_15 = arith.constant 0 : index
    %24 = vector.load %arg4[%c0_14, %c0_15] : memref<32x1xf32, #tpu.memory_space<vmem>>, vector<32x1xf32>
    tpu.vector_store %arg4[%c0_14, %c0_15], %23 {strides = array<i32>} : memref<32x1xf32, #tpu.memory_space<vmem>>, vector<32x1xf32>,
    return
  }
  func.func @transform_0(%arg0: i32) -> (i32, i32) {
    %c0_i32 = arith.constant 0 : i32
    %c0_i32_0 = arith.constant 0 : i32
    %c0_i32_1 = arith.constant 0 : i32
    return %c0_i32, %c0_i32_0 : i32, i32
  }
  func.func @transform_1(%arg0: i32) -> (i32, i32) {
    %c0_i32 = arith.constant 0 : i32
    %c0_i32_0 = arith.constant 0 : i32
    return %arg0, %c0_i32 : i32, i32
  }
  func.func @transform_2(%arg0: i32) -> (i32, i32) {
    %c0_i32 = arith.constant 0 : i32
    %c0_i32_0 = arith.constant 0 : i32
    %c0_i32_1 = arith.constant 0 : i32
    return %c0_i32, %c0_i32_0 : i32, i32
  }
  func.func @transform_3(%arg0: i32) -> (i32, i32) {
    %c0_i32 = arith.constant 0 : i32
    %c0_i32_0 = arith.constant 0 : i32
    %c0_i32_1 = arith.constant 0 : i32
    return %c0_i32, %c0_i32_0 : i32, i32
  }
}

</mosaic_0001>

<bundles_post_ra>
// kernel: tpu_custom_call.1
= control target key start
LH: loop header
LB: loop body
LE: loop exit
PB: predicated region body
PF: predicated region fallthrough
CT: control target
= control target key end

     0   :  { %9 = vsyncpa [#allocation3], 0  ;;  %s427_s0 = inlined_call_operand.hbm [shape: f32[32,201], index: 0, kind: input, shape index: {}]   ;;  %s428_s1 = inlined_call_operand.hbm [shape: f32[16,201], index: 1, kind: input, shape index: {}]   ;;  %s429_s2 = inlined_call_operand.vmem [shape: f32[32,1], index: 2, kind: output, shape index: {0}]   ;;  %s430_s3 = inlined_call_operand.vmem [shape: f32[32,1], index: 3, kind: output, shape index: {1}]  }
   0x1   :  { %s15_s14 = sshll.u32 %s427_s0, 4  ;;  %s16_s14 = int_to_ptr.hbm [resolvable:$true] %s15_s14 }
   0x2   :  { %10 = vsyncpa [#allocation5], 0  ;;  %s288_s15 = smov [#allocation2]   ;;  %s28_s19 = sshll.u32 %s428_s1, 4  ;;  %s29_s19 = int_to_ptr.hbm [resolvable:$true] %s28_s19 }
   0x3   :  { %s17_s16 = sshll.u32 %s288_s15, 4  ;;  %s289_s20 = smov 256   ;;  %s18_s16 = int_to_ptr.vmem [resolvable:$true] %s17_s16 }
   0x4   :  { %s290_s21 = smov 16   ;;  %s291_s22 = smov [#allocation4]  }
   0x5   :  { %23 = dma.hbm_to_vmem [thread:$0]  %s16_s14, 1024, %s18_s16, [#allocation3], %s289_s20, %s289_s20, %s290_s21  }
   0x6   :  { %s30_s23 = sshll.u32 %s291_s22, 4  ;;  %s31_s23 = int_to_ptr.vmem [resolvable:$true] %s30_s23 }
   0x7   :  { %36 = dma.hbm_to_vmem [thread:$0]  %s29_s19, 512, %s31_s23, [#allocation5], %s289_s20, %s289_s20, %s290_s21  }
   0x8   :  { %284 = dma.done.wait [#allocation3], 1024  }
   0x9   :  { %285 = vsyncadd [#allocation3], 4294966272 }
   0xa   :  { %286 = dma.done.wait [#allocation5], 512  }
   0xb   :  { %287 = vsyncadd [#allocation5], 4294966784  ;;  %vm70_vm0 = vcmask 596992   ;;  %v68_v0 = vld [vmem:[#allocation4 + $0x10] sm:$0xff]  ;;  %v69_v1 = vld [vmem:[#allocation4 + $0x18] sm:$0xff]  ;;  %v147_v12 = vlaneseq  ;;  %vm49_vm1 = vcmask 7168  }
   0xc   :  { %103 = vmatpush.xpose.msra.mxu0 %v68_v0  ;;  %227 = vmatpush.xpose.msra.mxu2 %v68_v0  ;;  %v66_v2 = vld [vmem:[#allocation4] sm:$0xff]  ;;  %v67_v3 = vld [vmem:[#allocation4 + $0x8] sm:$0xff]  ;;  %v60_v8 = vld [vmem:[#allocation2 + $0x10] sm:$0xff]  ;;  %v292_v14 = vmov 0.0   ;;  %vm161_vm3 = vcmask 130048  }
   0xd   :  { %221 = vmatpush.xpose.msk.msra.mxu1 %vm70_vm0, %v69_v1  ;;  %229 = vmatpush.xpose.msk.msra.mxu3 %vm70_vm0, %v69_v1  ;;  %v58_v4 = vld [vmem:[#allocation2] sm:$0xff]  ;;  %v59_v6 = vld [vmem:[#allocation2 + $0x8] sm:$0xff]  ;;  %v64_v9 = vld [vmem:[#allocation2 + $0x30] sm:$0xff]  ;;  %v148_v13 = vand.u32 127, %v147_v12  ;;  %50 = vst.msk [vmem:[%s429_s2] sm:$0xff] %vm49_vm1, %v292_v14 }
   0xe   :  { %v62_v5 = vld [vmem:[#allocation2 + $0x20] sm:$0xff]  ;;  %v63_v7 = vld [vmem:[#allocation2 + $0x28] sm:$0xff]  ;;  %v61_v10 = vld [vmem:[#allocation2 + $0x18] sm:$0xff]  ;;  %51 = vst.msk [vmem:[%s429_s2 + $0x8] sm:$0xff] %vm49_vm1, %v292_v14 }
   0xf   :  { %v65_v11 = vld [vmem:[#allocation2 + $0x38] sm:$0xff]  ;;  %52 = vst.msk [vmem:[%s429_s2 + $0x10] sm:$0xff] %vm49_vm1, %v292_v14  ;;  %vm152_vm2 = vcmp.lt.s32.totalorder %v148_v13, 16 }
  0x10   :  { %104 = vmatpush.xpose.msra.mxu0 %v66_v2  ;;  %228 = vmatpush.xpose.msra.mxu2 %v66_v2  ;;  %53 = vst.msk [vmem:[%s429_s2 + $0x18] sm:$0xff] %vm49_vm1, %v292_v14 }
  0x11   :  { %222 = vmatpush.xpose.msk.msra.mxu1 %vm70_vm0, %v67_v3  ;;  %230 = vmatpush.xpose.msk.msra.mxu3 %vm70_vm0, %v67_v3  ;;  %54 = vst.msk [vmem:[%s430_s3] sm:$0xff] %vm49_vm1, %v292_v14 }
  0x12   :  { %55 = vst.msk [vmem:[%s430_s3 + $0x8] sm:$0xff] %vm49_vm1, %v292_v14 }
  0x13   :  { %105 = vmatmul.f32.vlgmr.msra.gmra.mxu0 %v58_v4  ;;  %111 = vmatmul.f32.vlgmr.msra.gmra.mxu2 %v62_v5  ;;  %56 = vst.msk [vmem:[%s430_s3 + $0x10] sm:$0xff] %vm49_vm1, %v292_v14 }
  0x14   :  { %223 = vmatmul.msk.f32.vlgmr.msra.gmra.mxu1 %vm70_vm0, %v59_v6  ;;  %225 = vmatmul.msk.f32.vlgmr.msra.gmra.mxu3 %vm70_vm0, %v63_v7  ;;  %57 = vst.msk [vmem:[%s430_s3 + $0x18] sm:$0xff] %vm49_vm1, %v292_v14  ;;  %v157_v43 = vld [vmem:[%s429_s2] sm:$0xff] }
  0x15   :  { %v158_v51 = vld [vmem:[%s429_s2 + $0x8] sm:$0xff] }
  0x16   :  { %v159_v49 = vld [vmem:[%s429_s2 + $0x10] sm:$0xff] }
  0x17   :  { %v160_v58 = vld [vmem:[%s429_s2 + $0x18] sm:$0xff] }
  0x18   :  { %v183_v45 = vld [vmem:[%s430_s3] sm:$0xff] }
  0x19   :  { %v184_v54 = vld [vmem:[%s430_s3 + $0x8] sm:$0xff] }
  0x1a   :  { %v185_v60 = vld [vmem:[%s430_s3 + $0x10] sm:$0xff] }
  0x1b   :  { %108 = vmatmul.f32.gmra.mxu0 %v60_v8  ;;  %114 = vmatmul.f32.gmra.mxu2 %v64_v9  ;;  %v186_v0 = vld [vmem:[%s430_s3 + $0x18] sm:$0xff] }
  0x1c   :  { %224 = vmatmul.msk.f32.gmra.mxu1 %vm70_vm0, %v61_v10  ;;  %226 = vmatmul.msk.f32.gmra.mxu3 %vm70_vm0, %v65_v11 }
  0x90   :  { %v106_v15 = vpop.f32.mrf.mxu0 }
  0x91   :  { %v135_v16 = vpop.f32.mrf.mxu1 }
  0x92   :  { %v136_v17 = vadd.f32 %v135_v16, %v106_v15 }
  0x94   :  { %v153_v18 = vsel %vm152_vm2, %v136_v17, 0.0 }
  0x95   :  { %v162_v19 = vsel %vm161_vm3, %v153_v18, 0.0  ;;  %v187_v20 = vmul.f32 %v153_v18, %v153_v18 }
  0x96   :  { %163 = vadd.xlane.f32.xlu0 %v162_v19  ;;  %v112_v21 = vpop.f32.mrf.mxu2 }
  0x97   :  { %v141_v22 = vpop.f32.mrf.mxu3  ;;  %v191_v23 = vsel %vm161_vm3, %v187_v20, 0.0 }
  0x98   :  { %v142_v24 = vadd.f32 %v141_v22, %v112_v21  ;;  %v109_v25 = vpop.f32.mrf.mxu0  ;;  %192 = vadd.xlane.f32.xlu2 %v191_v23 }
  0x99   :  { %v138_v26 = vpop.f32.mrf.mxu1 }
  0x9a   :  { %v139_v27 = vadd.f32 %v138_v26, %v109_v25  ;;  %v155_v28 = vsel %vm152_vm2, %v142_v24, 0.0 }
  0x9b   :  { %v168_v29 = vsel %vm161_vm3, %v155_v28, 0.0  ;;  %v189_v37 = vmul.f32 %v155_v28, %v155_v28 }
  0x9c   :  { %169 = vadd.xlane.f32.xlu1 %v168_v29  ;;  %v154_v30 = vsel %vm152_vm2, %v139_v27, 0.0 }
  0x9d   :  { %v165_v31 = vsel %vm161_vm3, %v154_v30, 0.0  ;;  %v188_v32 = vmul.f32 %v154_v30, %v154_v30  ;;  %v197_v40 = vsel %vm161_vm3, %v189_v37, 0.0 }
  0x9e   :  { %166 = vadd.xlane.f32.xlu0 %v165_v31  ;;  %v115_v33 = vpop.f32.mrf.mxu2 }
  0x9f   :  { %v144_v34 = vpop.f32.mrf.mxu3  ;;  %v194_v35 = vsel %vm161_vm3, %v188_v32, 0.0 }
  0xa0   :  { %v145_v36 = vadd.f32 %v144_v34, %v115_v33  ;;  %195 = vadd.xlane.f32.xlu2 %v194_v35 }
  0xa2   :  { %v156_v38 = vsel %vm152_vm2, %v145_v36, 0.0 }
  0xa3   :  { %v171_v39 = vsel %vm161_vm3, %v156_v38, 0.0  ;;  %v190_v41 = vmul.f32 %v156_v38, %v156_v38 }
  0xa4   :  { %172 = vadd.xlane.f32.xlu1 %v171_v39 }
  0xa5   :  { %v200_v42 = vsel %vm161_vm3, %v190_v41, 0.0 }
  0xa6   :  { %198 = vadd.xlane.f32.xlu0 %v197_v40 }
  0xac   :  { %201 = vadd.xlane.f32.xlu1 %v200_v42 }
 0x109   :  { %v164_v44 = vpop.xlane.xlu0 %163 }
 0x10a   :  { %v174_v46 = vadd.f32 %v164_v44, %v157_v43 }
 0x10b   :  { %v193_v47 = vpop.xlane.xlu2 %192 }
 0x10c   :  { %179 = vst.msk [vmem:[%s429_s2] sm:$0xff] %vm49_vm1, %v174_v46  ;;  %v203_v48 = vadd.f32 %v193_v47, %v183_v45 }
 0x10e   :  { %207 = vst.msk [vmem:[%s430_s3] sm:$0xff] %vm49_vm1, %v203_v48 }
 0x10f   :  { %v170_v50 = vpop.xlane.xlu1 %169 }
 0x110   :  { %v176_v52 = vadd.f32 %v170_v50, %v159_v49 }
 0x111   :  { %v167_v53 = vpop.xlane.xlu0 %166 }
 0x112   :  { %181 = vst.msk [vmem:[%s429_s2 + $0x10] sm:$0xff] %vm49_vm1, %v176_v52  ;;  %v175_v55 = vadd.f32 %v167_v53, %v158_v51 }
 0x113   :  { %v196_v56 = vpop.xlane.xlu2 %195 }
 0x114   :  { %180 = vst.msk [vmem:[%s429_s2 + $0x8] sm:$0xff] %vm49_vm1, %v175_v55  ;;  %v204_v57 = vadd.f32 %v196_v56, %v184_v54 }
 0x116   :  { %208 = vst.msk [vmem:[%s430_s3 + $0x8] sm:$0xff] %vm49_vm1, %v204_v57 }
 0x117   :  { %v173_v59 = vpop.xlane.xlu1 %172 }
 0x118   :  { %v177_v61 = vadd.f32 %v173_v59, %v160_v58 }
 0x119   :  { %v199_v62 = vpop.xlane.xlu0 %198 }
 0x11a   :  { %182 = vst.msk [vmem:[%s429_s2 + $0x18] sm:$0xff] %vm49_vm1, %v177_v61  ;;  %v205_v63 = vadd.f32 %v199_v62, %v185_v60 }
 0x11c   :  { %209 = vst.msk [vmem:[%s430_s3 + $0x10] sm:$0xff] %vm49_vm1, %v205_v63 }
 0x11f   :  { %v202_v1 = vpop.xlane.xlu1 %201 }
 0x120   :  { %v206_v2 = vadd.f32 %v202_v1, %v186_v0 }
 0x122   :  { %210 = vst.msk [vmem:[%s430_s3 + $0x18] sm:$0xff] %vm49_vm1, %v206_v2 }
 0x123   :  { %219 = vsyncpa [#allocation3], 1 }
 0x124   :  { %220 = vsyncpa [#allocation5], 1 }

</bundles_post_ra>
